<compile_context>
chip_gen: v5e
topology: v5e:2x2
jax: 0.10.0
libtpu: 0.0.40
codegen_flags: <defaults>
</compile_context>

<pallas_src>
import math

import jax
import jax.numpy as jnp
from jax.experimental import pallas as pl
from jax.experimental.pallas import tpu as pltpu


def _round_up(v, m):
    return (v + m - 1) // m * m


def _level_params(W, H, n):
    """Replicates the PyTorch kernel/stride/output-size math exactly."""
    if n <= 0 or n > W or n > H:
        raise ValueError(
            f"out_side entry n={n} must satisfy 1 <= n <= min(W={W}, H={H}) "
            "(PyTorch MaxPool2d would get stride=0 otherwise)")
    w_r, h_r = math.ceil(W / n), math.ceil(H / n)        # kernel_size
    s_w, s_h = W // n, H // n                            # stride
    out_w = (W - w_r) // s_w + 1                         # default MaxPool2d output
    out_h = (H - h_r) // s_h + 1
    return dict(n=n, w_r=w_r, h_r=h_r, s_w=s_w, s_h=s_h,
                out_w=out_w, out_h=out_h, npos=out_w * out_h,
                nonoverlap=(w_r == s_w and h_r == s_h))


def _choose_blocks(B, C, W, H, itemsize, budget_bytes=8 * 1024 * 1024):
    """Pick (bb, cb) divisors of (B, C) so one padded (bb, cb, W, H) VMEM block
    stays within a budget that double-buffers comfortably on every generation
    (v7x has only 64 MiB physical VMEM per TensorCore)."""
    per_slice = _round_up(W, 8) * _round_up(H, 128) * itemsize  # padded bytes per (1,1,W,H)
    cb = 1
    for d in sorted((d for d in range(1, C + 1) if C % d == 0), reverse=True):
        if d * per_slice <= budget_bytes:
            cb = d
            break
    bb = 1
    for d in sorted((d for d in range(1, B + 1) if B % d == 0), reverse=True):
        if d * cb * per_slice <= budget_bytes:
            bb = d
            break
    # TODO(synk): add W-axis spatial tiling (along finest-level window
    # boundaries) for feature maps so large that even a (1, 1, W, H) block
    # exceeds the VMEM budget.
    return bb, cb, per_slice


def _make_spp_kernel(levels):
    """Fused kernel over all pyramid levels for one (batch, channel) block."""
    # Compute the finest grids first so coarser nested levels can be derived.
    comp_order = sorted(range(len(levels)), key=lambda i: -levels[i]["npos"])

    def _concat_rows(rows, axis):
        return rows[0] if len(rows) == 1 else jnp.concatenate(rows, axis=axis)

    def _pool_cols(wp, out_h, s_h, h_r):
        # wp: (bb, cb, out_w, H) -> (bb, cb, out_w, out_h); H pooling on lanes.
        cols = [jnp.max(wp[..., j * s_h: j * s_h + h_r], axis=3, keepdims=True)
                for j in range(out_h)]
        return _concat_rows(cols, axis=3)

    def kernel(x_ref, *o_refs):
        # x_ref: (bb, cb, W, H) native NCHW block (W -> sublanes, H -> lanes)
        # o_refs[k]: (bb, cb, out_w_k, out_h_k), one per pyramid level
        slabs = [None] * len(levels)

        def direct(lv):
            # Pass 1: pool along W straight from the ref -- window-sized loads,
            # never the whole block as a single value.
            rows = [jnp.max(x_ref[:, :, i * lv["s_w"]: i * lv["s_w"] + lv["w_r"], :],
                            axis=2, keepdims=True)
                    for i in range(lv["out_w"])]
            wp = _concat_rows(rows, axis=2)              # (bb, cb, out_w, H)
            # Pass 2: pool along H.
            return _pool_cols(wp, lv["out_h"], lv["s_h"], lv["h_r"])

        def derived(lv, fine, fv):
            # Coarse non-overlapping level from a finer nested one: max over
            # r x r groups of fine-window maxima (pure vreg-vs-vreg maxima).
            r = fv["n"] // lv["n"]
            rows = [jnp.max(fine[:, :, i * r:(i + 1) * r, :], axis=2, keepdims=True)
                    for i in range(lv["out_w"])]
            wp = _concat_rows(rows, axis=2)              # (bb, cb, out_w, fv.out_h)
            return _pool_cols(wp, lv["out_h"], r, r)

        for idx in comp_order:
            lv = levels[idx]
            src = None
            if lv["nonoverlap"]:
                cands = [j for j in comp_order
                         if slabs[j] is not None
                         and levels[j]["nonoverlap"]
                         and levels[j]["n"] > lv["n"]
                         and levels[j]["n"] % lv["n"] == 0]
                if cands:
                    src = min(cands, key=lambda j: levels[j]["n"])
            slabs[idx] = direct(lv) if src is None else derived(lv, slabs[src], levels[src])

        # One full-block, unmasked store per level.
        for idx, o_ref in enumerate(o_refs):
            o_ref[...] = slabs[idx].astype(o_ref.dtype)

    return kernel


def spatial_pyramid_pool2d(x, out_side=(1, 2, 4)):
    """Pallas implementation of SpatialPyramidPool2D.forward. x: (B, C, W, H)."""
    B, C, W, H = x.shape
    levels = [_level_params(W, H, n) for n in out_side]

    bb, cb, per_slice = _choose_blocks(B, C, W, H, x.dtype.itemsize)
    grid = (B // bb, C // cb)

    out_shapes = tuple(
        jax.ShapeDtypeStruct((B, C, lv["out_w"], lv["out_h"]), x.dtype)
        for lv in levels)
    out_specs = tuple(
        pl.BlockSpec((bb, cb, lv["out_w"], lv["out_h"]), lambda b, c: (b, c, 0, 0))
        for lv in levels)

    # Scoped-VMEM budget: double-buffered input block + (small) output blocks.
    in_blk = bb * cb * per_slice
    out_blk = sum(bb * cb * _round_up(lv["out_w"], 8) * _round_up(lv["out_h"], 128)
                  * x.dtype.itemsize for lv in levels)
    vmem_limit = int(min(max(2 * (in_blk + out_blk) + (4 << 20), 32 << 20), 64 << 20))

    pooled = pl.pallas_call(
        _make_spp_kernel(levels),
        out_shape=out_shapes,
        grid=grid,
        in_specs=[pl.BlockSpec((bb, cb, W, H), lambda b, c: (b, c, 0, 0))],
        out_specs=out_specs,
        compiler_params=pltpu.CompilerParams(
            dimension_semantics=("parallel", "parallel"),
            vmem_limit_bytes=vmem_limit),
    )(x)

    # Tiny layout plumbing back to PyTorch's y.view(B, -1) order, touching only
    # the pooled output (sum(n^2) * C elements per batch).
    return jnp.concatenate([y.reshape(B, -1) for y in pooled], axis=1)


def _reference(x, out_side=(1, 2, 4)):
    """Pure-JAX reference mirroring the PyTorch forward (no Pallas)."""
    B, C, W, H = x.shape
    outs = []
    for n in out_side:
        lv = _level_params(W, H, n)
        y = jnp.stack(
            [jnp.stack(
                [jnp.max(x[:, :,
                           i * lv["s_w"]: i * lv["s_w"] + lv["w_r"],
                           j * lv["s_h"]: j * lv["s_h"] + lv["h_r"]],
                         axis=(2, 3))
                 for j in range(lv["out_h"])], axis=-1)
             for i in range(lv["out_w"])], axis=-2)
        outs.append(y.reshape(B, -1))
    return jnp.concatenate(outs, axis=1)


if __name__ == "__main__":
    # SpatialPyramidPool2D has no learned parameters; its only config is out_side.
    out_side = (1, 2, 4)

    key = jax.random.PRNGKey(0)
    x = jax.random.normal(key, (2, 4, 16, 16), dtype=jnp.float32)

    out = jax.block_until_ready(spatial_pyramid_pool2d(x, out_side))
    expected_dim = 4 * sum(n * n for n in out_side)     # C * sum(n^2) = 84
    assert out.shape == (2, expected_dim), out.shape

    ref = _reference(x, out_side)
    assert jnp.allclose(out, ref), "Pallas SPP output mismatch vs JAX reference"

    # Also exercise the overlapping-window / non-square fallback path.
    x2 = jax.random.normal(jax.random.PRNGKey(0), (2, 3, 10, 7), dtype=jnp.float32)
    out2 = jax.block_until_ready(spatial_pyramid_pool2d(x2, (1, 2, 3)))
    ref2 = _reference(x2, (1, 2, 3))
    assert out2.shape == ref2.shape
    assert jnp.allclose(out2, ref2), "Pallas SPP (overlap path) mismatch vs reference"

    print("KERNEL_OK")
</pallas_src>

<mosaic_0001>
module attributes {stable_mosaic.version = 11 : i64} {
  func.func @kernel(%arg0: i32, %arg1: i32, %arg2: memref<2x4x16x16xf32, #tpu.memory_space<vmem>>, %arg3: memref<2x4x1x1xf32, #tpu.memory_space<vmem>>, %arg4: memref<2x4x2x2xf32, #tpu.memory_space<vmem>>, %arg5: memref<2x4x4x4xf32, #tpu.memory_space<vmem>>) attributes {dimension_semantics = [#tpu.dimension_semantics<parallel>, #tpu.dimension_semantics<parallel>], iteration_bounds = array<i64: 1, 1>, scalar_prefetch = 0 : i64, scratch_operands = 0 : i64, tpu.core_type = #tpu.core_type<tc>, window_params = [{transform_indices = @transform_0, window_bounds = array<i64: 2, 4, 16, 16>}, {transform_indices = @transform_1, window_bounds = array<i64: 2, 4, 1, 1>}, {transform_indices = @transform_2, window_bounds = array<i64: 2, 4, 2, 2>}, {transform_indices = @transform_3, window_bounds = array<i64: 2, 4, 4, 4>}]} {
    %c0 = arith.constant 0 : index
    %c0_0 = arith.constant 0 : index
    %c0_1 = arith.constant 0 : index
    %c0_2 = arith.constant 0 : index
    %0 = vector.load %arg2[%c0, %c0_0, %c0_1, %c0_2] : memref<2x4x16x16xf32, #tpu.memory_space<vmem>>, vector<2x4x4x16xf32>
    %cst = arith.constant dense<0xFF800000> : vector<2x4x16xf32>
    %1 = vector.multi_reduction <maximumf>, %0, %cst [2] : vector<2x4x4x16xf32> to vector<2x4x16xf32>
    %2 = vector.shape_cast %1 : vector<2x4x16xf32> to vector<2x4x1x16xf32>
    %c0_3 = arith.constant 0 : index
    %c0_4 = arith.constant 0 : index
    %c4 = arith.constant 4 : index
    %c0_5 = arith.constant 0 : index
    %3 = vector.load %arg2[%c0_3, %c0_4, %c4, %c0_5] : memref<2x4x16x16xf32, #tpu.memory_space<vmem>>, vector<2x4x4x16xf32>
    %cst_6 = arith.constant dense<0xFF800000> : vector<2x4x16xf32>
    %4 = vector.multi_reduction <maximumf>, %3, %cst_6 [2] : vector<2x4x4x16xf32> to vector<2x4x16xf32>
    %5 = vector.shape_cast %4 : vector<2x4x16xf32> to vector<2x4x1x16xf32>
    %c0_7 = arith.constant 0 : index
    %c0_8 = arith.constant 0 : index
    %c8 = arith.constant 8 : index
    %c0_9 = arith.constant 0 : index
    %6 = vector.load %arg2[%c0_7, %c0_8, %c8, %c0_9] : memref<2x4x16x16xf32, #tpu.memory_space<vmem>>, vector<2x4x4x16xf32>
    %cst_10 = arith.constant dense<0xFF800000> : vector<2x4x16xf32>
    %7 = vector.multi_reduction <maximumf>, %6, %cst_10 [2] : vector<2x4x4x16xf32> to vector<2x4x16xf32>
    %8 = vector.shape_cast %7 : vector<2x4x16xf32> to vector<2x4x1x16xf32>
    %c0_11 = arith.constant 0 : index
    %c0_12 = arith.constant 0 : index
    %c12 = arith.constant 12 : index
    %c0_13 = arith.constant 0 : index
    %9 = vector.load %arg2[%c0_11, %c0_12, %c12, %c0_13] : memref<2x4x16x16xf32, #tpu.memory_space<vmem>>, vector<2x4x4x16xf32>
    %cst_14 = arith.constant dense<0xFF800000> : vector<2x4x16xf32>
    %10 = vector.multi_reduction <maximumf>, %9, %cst_14 [2] : vector<2x4x4x16xf32> to vector<2x4x16xf32>
    %11 = vector.shape_cast %10 : vector<2x4x16xf32> to vector<2x4x1x16xf32>
    %12 = tpu.concatenate %2, %5, %8, %11 in 2 : vector<2x4x1x16xf32>, vector<2x4x1x16xf32>, vector<2x4x1x16xf32>, vector<2x4x1x16xf32> -> vector<2x4x4x16xf32>
    %13 = vector.extract_strided_slice %12 {offsets = [0, 0, 0, 0], sizes = [2, 4, 4, 4], strides = [1, 1, 1, 1]} : vector<2x4x4x16xf32> to vector<2x4x4x4xf32>
    %cst_15 = arith.constant dense<0xFF800000> : vector<2x4x4xf32>
    %14 = vector.multi_reduction <maximumf>, %13, %cst_15 [3] : vector<2x4x4x4xf32> to vector<2x4x4xf32>
    %15 = vector.shape_cast %14 : vector<2x4x4xf32> to vector<2x4x4x1xf32>
    %16 = vector.extract_strided_slice %12 {offsets = [0, 0, 0, 4], sizes = [2, 4, 4, 4], strides = [1, 1, 1, 1]} : vector<2x4x4x16xf32> to vector<2x4x4x4xf32>
    %cst_16 = arith.constant dense<0xFF800000> : vector<2x4x4xf32>
    %17 = vector.multi_reduction <maximumf>, %16, %cst_16 [3] : vector<2x4x4x4xf32> to vector<2x4x4xf32>
    %18 = vector.shape_cast %17 : vector<2x4x4xf32> to vector<2x4x4x1xf32>
    %19 = vector.extract_strided_slice %12 {offsets = [0, 0, 0, 8], sizes = [2, 4, 4, 4], strides = [1, 1, 1, 1]} : vector<2x4x4x16xf32> to vector<2x4x4x4xf32>
    %cst_17 = arith.constant dense<0xFF800000> : vector<2x4x4xf32>
    %20 = vector.multi_reduction <maximumf>, %19, %cst_17 [3] : vector<2x4x4x4xf32> to vector<2x4x4xf32>
    %21 = vector.shape_cast %20 : vector<2x4x4xf32> to vector<2x4x4x1xf32>
    %22 = vector.extract_strided_slice %12 {offsets = [0, 0, 0, 12], sizes = [2, 4, 4, 4], strides = [1, 1, 1, 1]} : vector<2x4x4x16xf32> to vector<2x4x4x4xf32>
    %cst_18 = arith.constant dense<0xFF800000> : vector<2x4x4xf32>
    %23 = vector.multi_reduction <maximumf>, %22, %cst_18 [3] : vector<2x4x4x4xf32> to vector<2x4x4xf32>
    %24 = vector.shape_cast %23 : vector<2x4x4xf32> to vector<2x4x4x1xf32>
    %25 = tpu.concatenate %15, %18, %21, %24 in 3 : vector<2x4x4x1xf32>, vector<2x4x4x1xf32>, vector<2x4x4x1xf32>, vector<2x4x4x1xf32> -> vector<2x4x4x4xf32>
    %26 = vector.extract_strided_slice %25 {offsets = [0, 0, 0, 0], sizes = [2, 4, 2, 4], strides = [1, 1, 1, 1]} : vector<2x4x4x4xf32> to vector<2x4x2x4xf32>
    %cst_19 = arith.constant dense<0xFF800000> : vector<2x4x4xf32>
    %27 = vector.multi_reduction <maximumf>, %26, %cst_19 [2] : vector<2x4x2x4xf32> to vector<2x4x4xf32>
    %28 = vector.shape_cast %27 : vector<2x4x4xf32> to vector<2x4x1x4xf32>
    %29 = vector.extract_strided_slice %25 {offsets = [0, 0, 2, 0], sizes = [2, 4, 2, 4], strides = [1, 1, 1, 1]} : vector<2x4x4x4xf32> to vector<2x4x2x4xf32>
    %cst_20 = arith.constant dense<0xFF800000> : vector<2x4x4xf32>
    %30 = vector.multi_reduction <maximumf>, %29, %cst_20 [2] : vector<2x4x2x4xf32> to vector<2x4x4xf32>
    %31 = vector.shape_cast %30 : vector<2x4x4xf32> to vector<2x4x1x4xf32>
    %32 = tpu.concatenate %28, %31 in 2 : vector<2x4x1x4xf32>, vector<2x4x1x4xf32> -> vector<2x4x2x4xf32>
    %33 = vector.extract_strided_slice %32 {offsets = [0, 0, 0, 0], sizes = [2, 4, 2, 2], strides = [1, 1, 1, 1]} : vector<2x4x2x4xf32> to vector<2x4x2x2xf32>
    %cst_21 = arith.constant dense<0xFF800000> : vector<2x4x2xf32>
    %34 = vector.multi_reduction <maximumf>, %33, %cst_21 [3] : vector<2x4x2x2xf32> to vector<2x4x2xf32>
    %35 = vector.shape_cast %34 : vector<2x4x2xf32> to vector<2x4x2x1xf32>
    %36 = vector.extract_strided_slice %32 {offsets = [0, 0, 0, 2], sizes = [2, 4, 2, 2], strides = [1, 1, 1, 1]} : vector<2x4x2x4xf32> to vector<2x4x2x2xf32>
    %cst_22 = arith.constant dense<0xFF800000> : vector<2x4x2xf32>
    %37 = vector.multi_reduction <maximumf>, %36, %cst_22 [3] : vector<2x4x2x2xf32> to vector<2x4x2xf32>
    %38 = vector.shape_cast %37 : vector<2x4x2xf32> to vector<2x4x2x1xf32>
    %39 = tpu.concatenate %35, %38 in 3 : vector<2x4x2x1xf32>, vector<2x4x2x1xf32> -> vector<2x4x2x2xf32>
    %cst_23 = arith.constant dense<0xFF800000> : vector<2x4x2xf32>
    %40 = vector.multi_reduction <maximumf>, %39, %cst_23 [2] : vector<2x4x2x2xf32> to vector<2x4x2xf32>
    %41 = vector.shape_cast %40 : vector<2x4x2xf32> to vector<2x4x1x2xf32>
    %cst_24 = arith.constant dense<0xFF800000> : vector<2x4x1xf32>
    %42 = vector.multi_reduction <maximumf>, %41, %cst_24 [3] : vector<2x4x1x2xf32> to vector<2x4x1xf32>
    %43 = vector.shape_cast %42 : vector<2x4x1xf32> to vector<2x4x1x1xf32>
    %c0_25 = arith.constant 0 : index
    %c0_26 = arith.constant 0 : index
    %c0_27 = arith.constant 0 : index
    %c0_28 = arith.constant 0 : index
    %44 = vector.load %arg3[%c0_25, %c0_26, %c0_27, %c0_28] : memref<2x4x1x1xf32, #tpu.memory_space<vmem>>, vector<2x4x1x1xf32>
    tpu.vector_store %arg3[%c0_25, %c0_26, %c0_27, %c0_28], %43 {strides = array<i32>} : memref<2x4x1x1xf32, #tpu.memory_space<vmem>>, vector<2x4x1x1xf32>,
    %c0_29 = arith.constant 0 : index
    %c0_30 = arith.constant 0 : index
    %c0_31 = arith.constant 0 : index
    %c0_32 = arith.constant 0 : index
    %45 = vector.load %arg4[%c0_29, %c0_30, %c0_31, %c0_32] : memref<2x4x2x2xf32, #tpu.memory_space<vmem>>, vector<2x4x2x2xf32>
    tpu.vector_store %arg4[%c0_29, %c0_30, %c0_31, %c0_32], %39 {strides = array<i32>} : memref<2x4x2x2xf32, #tpu.memory_space<vmem>>, vector<2x4x2x2xf32>,
    %c0_33 = arith.constant 0 : index
    %c0_34 = arith.constant 0 : index
    %c0_35 = arith.constant 0 : index
    %c0_36 = arith.constant 0 : index
    %46 = vector.load %arg5[%c0_33, %c0_34, %c0_35, %c0_36] : memref<2x4x4x4xf32, #tpu.memory_space<vmem>>, vector<2x4x4x4xf32>
    tpu.vector_store %arg5[%c0_33, %c0_34, %c0_35, %c0_36], %25 {strides = array<i32>} : memref<2x4x4x4xf32, #tpu.memory_space<vmem>>, vector<2x4x4x4xf32>,
    return
  }
  func.func @transform_0(%arg0: i32, %arg1: i32) -> (i32, i32, i32, i32) {
    %c0_i32 = arith.constant 0 : i32
    %c0_i32_0 = arith.constant 0 : i32
    %c0_i32_1 = arith.constant 0 : i32
    return %arg0, %arg1, %c0_i32, %c0_i32_0 : i32, i32, i32, i32
  }
  func.func @transform_1(%arg0: i32, %arg1: i32) -> (i32, i32, i32, i32) {
    %c0_i32 = arith.constant 0 : i32
    %c0_i32_0 = arith.constant 0 : i32
    %c0_i32_1 = arith.constant 0 : i32
    return %arg0, %arg1, %c0_i32, %c0_i32_0 : i32, i32, i32, i32
  }
  func.func @transform_2(%arg0: i32, %arg1: i32) -> (i32, i32, i32, i32) {
    %c0_i32 = arith.constant 0 : i32
    %c0_i32_0 = arith.constant 0 : i32
    %c0_i32_1 = arith.constant 0 : i32
    return %arg0, %arg1, %c0_i32, %c0_i32_0 : i32, i32, i32, i32
  }
  func.func @transform_3(%arg0: i32, %arg1: i32) -> (i32, i32, i32, i32) {
    %c0_i32 = arith.constant 0 : i32
    %c0_i32_0 = arith.constant 0 : i32
    %c0_i32_1 = arith.constant 0 : i32
    return %arg0, %arg1, %c0_i32, %c0_i32_0 : i32, i32, i32, i32
  }
}

</mosaic_0001>

<bundles_post_ra>
// kernel: tpu_custom_call.1
= control target key start
LH: loop header
LB: loop body
LE: loop exit
PB: predicated region body
PF: predicated region fallthrough
CT: control target
= control target key end

     0   :  { %9 = vsyncpa [#allocation3], 0  ;;  %s1142_s0 = inlined_call_operand.hbm [shape: f32[2,4,16,16], index: 0, kind: input, shape index: {}]   ;;  %s1143_s1 = inlined_call_operand.vmem [shape: f32[2,4,1,1], index: 1, kind: output, shape index: {0}]   ;;  %s1144_s2 = inlined_call_operand.vmem [shape: f32[2,4,2,2], index: 2, kind: output, shape index: {1}]   ;;  %s1145_s3 = inlined_call_operand.hbm [shape: f32[2,4,4,4], index: 3, kind: output, shape index: {2}]  }
   0x1   :  { %10 = vsyncpa [#allocation4], 0  ;;  %s15_s14 = sshll.u32 %s1142_s0, 4  ;;  %s809_s15 = smov [#allocation2]   ;;  %s16_s14 = int_to_ptr.hbm [resolvable:$true] %s15_s14 }
   0x2   :  { %s17_s16 = sshll.u32 %s809_s15, 4  ;;  %s810_s17 = smov 128   ;;  %s18_s16 = int_to_ptr.vmem [resolvable:$true] %s17_s16 }
   0x3   :  { %s811_s18 = smov 8  }
   0x4   :  { %23 = dma.hbm_to_vmem [thread:$0]  %s16_s14, 2048, %s18_s16, [#allocation3], %s810_s17, %s810_s17, %s811_s18  }
   0x5   :  { %805 = dma.done.wait [#allocation3], 2048  }
   0x6   :  { %806 = vsyncadd [#allocation3], 4294965248  ;;  %vm36_vm0 = vcmask 125952   ;;  %v32_v0 = vld [vmem:[#allocation2 + $0x40] sm:$0xf]  ;;  %vm285_vm1 = vcmask 1040384  }
   0x7   :  { %v97_v1 = vld [vmem:[#allocation2 + $0x44] sm:$0xf]  ;;  %v161_v2 = vld [vmem:[#allocation2 + $0x48] sm:$0xf]  ;;  %v65_v3 = vsel %vm36_vm0, %v32_v0, -inf  ;;  %vm294_vm2 = vcmask 1041408  }
   0x8   :  { %v129_v4 = vsel %vm36_vm0, %v97_v1, -inf  ;;  %v193_v5 = vsel %vm36_vm0, %v161_v2, -inf  ;;  %v225_v6 = vld [vmem:[#allocation2 + $0x4c] sm:$0xf]  ;;  %v66_v7 = vrot.slane %v65_v3, 4  ;;  %vm303_vm3 = vcmask 1042432  }
   0x9   :  { %v130_v8 = vrot.slane %v129_v4, 4  ;;  %v194_v9 = vrot.slane %v193_v5, 4  ;;  %v257_v10 = vsel %vm36_vm0, %v225_v6, -inf  ;;  %v30_v11 = vld [vmem:[#allocation2 + $0x20] sm:$0xf]  ;;  %vm312_vm4 = vcmask 27648  }
   0xa   :  { %v258_v12 = vrot.slane %v257_v10, 4  ;;  %v51_v13 = vsel %vm36_vm0, %v30_v11, -inf  ;;  %v95_v14 = vld [vmem:[#allocation2 + $0x24] sm:$0xf]  ;;  %v159_v15 = vld [vmem:[#allocation2 + $0x28] sm:$0xf]  ;;  %v67_v16 = vmax.f32 %v65_v3, %v66_v7 }
   0xb   :  { %v131_v17 = vmax.f32 %v129_v4, %v130_v8  ;;  %v195_v18 = vmax.f32 %v193_v5, %v194_v9  ;;  %v52_v19 = vrot.slane %v51_v13, 4  ;;  %v223_v20 = vld [vmem:[#allocation2 + $0x2c] sm:$0xf]  ;;  %v115_v22 = vsel %vm36_vm0, %v95_v14, -inf  ;;  %v28_v45 = vld [vmem:[#allocation2] sm:$0xf] }
   0xc   :  { %v259_v21 = vmax.f32 %v257_v10, %v258_v12  ;;  %v179_v23 = vsel %vm36_vm0, %v159_v15, -inf  ;;  %v243_v24 = vsel %vm36_vm0, %v223_v20, -inf  ;;  %v68_v25 = vrot.slane %v67_v16, 2  ;;  %v93_v50 = vld [vmem:[#allocation2 + $0x4] sm:$0xf]  ;;  %s734_s9 = sshll.u32 %s1145_s3, 4  ;;  %s735_s9 = int_to_ptr.hbm [resolvable:$true] %s734_s9 }
   0xd   :  { %v132_v26 = vrot.slane %v131_v17, 2  ;;  %v196_v27 = vrot.slane %v195_v18, 2  ;;  %v53_v28 = vmax.f32 %v51_v13, %v52_v19  ;;  %v116_v30 = vrot.slane %v115_v22, 4  ;;  %v157_v59 = vld [vmem:[#allocation2 + $0x8] sm:$0xf]  ;;  %s812_s10 = smov [#allocation5]  }
   0xe   :  { %v260_v29 = vrot.slane %v259_v21, 2  ;;  %v180_v31 = vrot.slane %v179_v23, 4  ;;  %v244_v32 = vrot.slane %v243_v24, 4  ;;  %v69_v33 = vmax.f32 %v67_v16, %v68_v25  ;;  %v221_v0 = vld [vmem:[#allocation2 + $0xc] sm:$0xf]  ;;  %s732_s11 = sshll.u32 %s812_s10, 4  ;;  %s733_s11 = int_to_ptr.vmem [resolvable:$true] %s732_s11 }
   0xf   :  { %v133_v34 = vmax.f32 %v131_v17, %v132_v26  ;;  %v197_v35 = vmax.f32 %v195_v18, %v196_v27  ;;  %v54_v36 = vrot.slane %v53_v28, 2  ;;  %v117_v38 = vmax.f32 %v115_v22, %v116_v30  ;;  %v33_v5 = vld [vmem:[#allocation2 + $0x50] sm:$0xf]  ;;  %v98_v10 = vld [vmem:[#allocation2 + $0x54] sm:$0xf]  ;;  %s813_s12 = smov 64  }
  0x10   :  { %v261_v37 = vmax.f32 %v259_v21, %v260_v29  ;;  %v181_v39 = vmax.f32 %v179_v23, %v180_v31  ;;  %v245_v40 = vmax.f32 %v243_v24, %v244_v32  ;;  %v70_v41 = vrot.slane %v69_v33, 1  ;;  %v162_v27 = vld [vmem:[#allocation2 + $0x58] sm:$0xf]  ;;  %s814_s13 = smov 4  }
  0x11   :  { %v134_v42 = vrot.slane %v133_v34, 1  ;;  %v198_v43 = vrot.slane %v197_v35, 1  ;;  %v55_v44 = vmax.f32 %v53_v28, %v54_v36  ;;  %v118_v47 = vrot.slane %v117_v38, 2  ;;  %v226_v36 = vld [vmem:[#allocation2 + $0x5c] sm:$0xf] }
  0x12   :  { %v262_v46 = vrot.slane %v261_v37, 1  ;;  %v182_v48 = vrot.slane %v181_v39, 2  ;;  %v246_v49 = vrot.slane %v245_v40, 2  ;;  %v71_v51 = vmax.f32 %v69_v33, %v70_v41 }
  0x13   :  { %v135_v52 = vmax.f32 %v133_v34, %v134_v42  ;;  %v199_v53 = vmax.f32 %v197_v35, %v198_v43  ;;  %v56_v54 = vrot.slane %v55_v44, 1  ;;  %v119_v56 = vmax.f32 %v117_v38, %v118_v47 }
  0x14   :  { %v263_v55 = vmax.f32 %v261_v37, %v262_v46  ;;  %v183_v57 = vmax.f32 %v181_v39, %v182_v48  ;;  %v247_v58 = vmax.f32 %v245_v40, %v246_v49  ;;  %v37_v62 = vsel %vm36_vm0, %v28_v45, -inf  ;;  %v31_v49 = vld [vmem:[#allocation2 + $0x30] sm:$0xf] }
  0x15   :  { %v290_v60 = vsel %vm285_vm1, %v71_v51, %v135_v52  ;;  %v57_v61 = vmax.f32 %v55_v44, %v56_v54  ;;  %v101_v63 = vsel %vm36_vm0, %v93_v50, -inf  ;;  %v120_v2 = vrot.slane %v119_v56, 1 }
  0x16   :  { %v299_v1 = vsel %vm294_vm2, %v290_v60, %v199_v53  ;;  %v184_v3 = vrot.slane %v183_v57, 1  ;;  %v248_v4 = vrot.slane %v247_v58, 1  ;;  %v38_v7 = vrot.slane %v37_v62, 4 }
  0x17   :  { %v851_v6 = vsel %vm303_vm3, %v299_v1, %v263_v55  ;;  %v102_v8 = vrot.slane %v101_v63, 4  ;;  %v165_v9 = vsel %vm36_vm0, %v157_v59, -inf  ;;  %v121_v12 = vmax.f32 %v119_v56, %v120_v2 }
  0x18   :  { %v325_v11 = vsel %vm312_vm4, %v851_v6, -inf  ;;  %v185_v13 = vmax.f32 %v183_v57, %v184_v3  ;;  %v249_v14 = vmax.f32 %v247_v58, %v248_v4  ;;  %v39_v15 = vmax.f32 %v37_v62, %v38_v7  ;;  %v96_v58 = vld [vmem:[#allocation2 + $0x34] sm:$0xf] }
  0x19   :  { %326 = vmax.xlane.f32.xlu2 %v325_v11  ;;  %v103_v16 = vmax.f32 %v101_v63, %v102_v8  ;;  %v166_v17 = vrot.slane %v165_v9, 4  ;;  %v229_v18 = vsel %vm36_vm0, %v221_v0, -inf  ;;  %v288_v19 = vsel %vm285_vm1, %v57_v61, %v121_v12  ;;  %v160_v8 = vld [vmem:[#allocation2 + $0x38] sm:$0xf] }
  0x1a   :  { %v230_v20 = vrot.slane %v229_v18, 4  ;;  %v72_v21 = vsel %vm36_vm0, %v33_v5, -inf  ;;  %v136_v22 = vsel %vm36_vm0, %v98_v10, -inf  ;;  %v297_v23 = vsel %vm294_vm2, %v288_v19, %v185_v13  ;;  %v94_v19 = vld [vmem:[#allocation2 + $0x14] sm:$0xf] }
  0x1b   :  { %v40_v24 = vrot.slane %v39_v15, 2  ;;  %v104_v25 = vrot.slane %v103_v16, 2  ;;  %v167_v26 = vmax.f32 %v165_v9, %v166_v17  ;;  %v862_v28 = vsel %vm303_vm3, %v297_v23, %v249_v14  ;;  %v224_v9 = vld [vmem:[#allocation2 + $0x3c] sm:$0xf]  ;;  %v29_v14 = vld [vmem:[#allocation2 + $0x10] sm:$0xf] }
  0x1c   :  { %v231_v29 = vmax.f32 %v229_v18, %v230_v20  ;;  %v73_v30 = vrot.slane %v72_v21, 4  ;;  %v137_v31 = vrot.slane %v136_v22, 4  ;;  %v319_v32 = vsel %vm312_vm4, %v862_v28, -inf }
  0x1d   :  { %v41_v33 = vmax.f32 %v39_v15, %v40_v24  ;;  %v105_v34 = vmax.f32 %v103_v16, %v104_v25  ;;  %v168_v35 = vrot.slane %v167_v26, 2  ;;  %320 = vmax.xlane.f32.xlu1 %v319_v32  ;;  %v200_v40 = vsel %vm36_vm0, %v162_v27, -inf }
  0x1e   :  { %v232_v37 = vrot.slane %v231_v29, 2  ;;  %v74_v38 = vmax.f32 %v72_v21, %v73_v30  ;;  %v138_v39 = vmax.f32 %v136_v22, %v137_v31  ;;  %v201_v44 = vrot.slane %v200_v40, 4 }
  0x1f   :  { %v42_v41 = vrot.slane %v41_v33, 1  ;;  %v106_v42 = vrot.slane %v105_v34, 1  ;;  %v169_v43 = vmax.f32 %v167_v26, %v168_v35  ;;  %v264_v48 = vsel %vm36_vm0, %v226_v36, -inf }
  0x20   :  { %v233_v45 = vmax.f32 %v231_v29, %v232_v37  ;;  %v75_v46 = vrot.slane %v74_v38, 2  ;;  %v139_v47 = vrot.slane %v138_v39, 2  ;;  %v202_v53 = vmax.f32 %v200_v40, %v201_v44 }
  0x21   :  { %v43_v50 = vmax.f32 %v41_v33, %v42_v41  ;;  %v107_v51 = vmax.f32 %v105_v34, %v106_v42  ;;  %v170_v52 = vrot.slane %v169_v43, 1  ;;  %v265_v57 = vrot.slane %v264_v48, 4  ;;  %v158_v33 = vld [vmem:[#allocation2 + $0x18] sm:$0xf] }
  0x22   :  { %v234_v54 = vrot.slane %v233_v45, 1  ;;  %v76_v55 = vmax.f32 %v74_v38, %v75_v46  ;;  %v140_v56 = vmax.f32 %v138_v39, %v139_v47  ;;  %v203_v61 = vrot.slane %v202_v53, 2 }
  0x23   :  { %v171_v59 = vmax.f32 %v169_v43, %v170_v52  ;;  %v286_v60 = vsel %vm285_vm1, %v43_v50, %v107_v51  ;;  %v58_v62 = vsel %vm36_vm0, %v31_v49, -inf  ;;  %v266_v2 = vmax.f32 %v264_v48, %v265_v57  ;;  %v222_v50 = vld [vmem:[#allocation2 + $0x1c] sm:$0xf]  ;;  %v35_v51 = vld [vmem:[#allocation2 + $0x70] sm:$0xf] }
  0x24   :  { %v235_v63 = vmax.f32 %v233_v45, %v234_v54  ;;  %v77_v0 = vrot.slane %v76_v55, 1  ;;  %v141_v1 = vrot.slane %v140_v56, 1  ;;  %v204_v4 = vmax.f32 %v202_v53, %v203_v61 }
  0x25   :  { %v295_v3 = vsel %vm294_vm2, %v286_v60, %v171_v59  ;;  %v59_v5 = vrot.slane %v58_v62, 4  ;;  %v122_v7 = vsel %vm36_vm0, %v96_v58, -inf  ;;  %v267_v13 = vrot.slane %v266_v2, 2 }
  0x26   :  { %v873_v10 = vsel %vm303_vm3, %v295_v3, %v235_v63  ;;  %v78_v11 = vmax.f32 %v76_v55, %v77_v0  ;;  %v142_v12 = vmax.f32 %v140_v56, %v141_v1  ;;  %v205_v16 = vrot.slane %v204_v4, 1 }
  0x27   :  { %v313_v15 = vsel %vm312_vm4, %v873_v10, -inf  ;;  %v60_v17 = vmax.f32 %v58_v62, %v59_v5  ;;  %v123_v18 = vrot.slane %v122_v7, 4  ;;  %v268_v20 = vmax.f32 %v266_v2, %v267_v13 }
  0x28   :  { %314 = vmax.xlane.f32.xlu0 %v313_v15  ;;  %v291_v21 = vsel %vm285_vm1, %v78_v11, %v142_v12  ;;  %v186_v22 = vsel %vm36_vm0, %v160_v8, -inf  ;;  %v250_v23 = vsel %vm36_vm0, %v224_v9, -inf  ;;  %v206_v24 = vmax.f32 %v204_v4, %v205_v16  ;;  %v100_v4 = vld [vmem:[#allocation2 + $0x74] sm:$0xf] }
  0x29   :  { %v61_v25 = vrot.slane %v60_v17, 2  ;;  %v124_v26 = vmax.f32 %v122_v7, %v123_v18  ;;  %v187_v27 = vrot.slane %v186_v22, 4  ;;  %v269_v29 = vrot.slane %v268_v20, 1 }
  0x2a   :  { %v251_v30 = vrot.slane %v250_v23, 4  ;;  %v44_v31 = vsel %vm36_vm0, %v29_v14, -inf  ;;  %v108_v32 = vsel %vm36_vm0, %v94_v19, -inf  ;;  %v300_v34 = vsel %vm294_vm2, %v291_v21, %v206_v24  ;;  %v164_v19 = vld [vmem:[#allocation2 + $0x78] sm:$0xf] }
  0x2b   :  { %v62_v35 = vmax.f32 %v60_v17, %v61_v25  ;;  %v125_v36 = vrot.slane %v124_v26, 2  ;;  %v188_v37 = vmax.f32 %v186_v22, %v187_v27  ;;  %v270_v38 = vmax.f32 %v268_v20, %v269_v29  ;;  %v228_v20 = vld [vmem:[#allocation2 + $0x7c] sm:$0xf] }
  0x2c   :  { %v252_v39 = vmax.f32 %v250_v23, %v251_v30  ;;  %v45_v40 = vrot.slane %v44_v31, 4  ;;  %v109_v41 = vrot.slane %v108_v32, 4  ;;  %v172_v45 = vsel %vm36_vm0, %v158_v33, -inf  ;;  %v34_v30 = vld [vmem:[#allocation2 + $0x60] sm:$0xf] }
  0x2d   :  { %v63_v42 = vrot.slane %v62_v35, 1  ;;  %v126_v43 = vmax.f32 %v124_v26, %v125_v36  ;;  %v189_v44 = vrot.slane %v188_v37, 2  ;;  %v885_v46 = vsel %vm303_vm3, %v300_v34, %v270_v38 }
  0x2e   :  { %v253_v47 = vrot.slane %v252_v39, 2  ;;  %v46_v48 = vmax.f32 %v44_v31, %v45_v40  ;;  %v110_v49 = vmax.f32 %v108_v32, %v109_v41  ;;  %v328_v52 = vsel %vm312_vm4, %v885_v46, -inf }
  0x2f   :  { %v64_v53 = vmax.f32 %v62_v35, %v63_v42  ;;  %v127_v54 = vrot.slane %v126_v43, 1  ;;  %v190_v55 = vmax.f32 %v188_v37, %v189_v44  ;;  %329 = vmax.xlane.f32.xlu2 %v328_v52  ;;  %v173_v59 = vrot.slane %v172_v45, 4  ;;  %v99_v42 = vld [vmem:[#allocation2 + $0x64] sm:$0xf] }
  0x30   :  { %v254_v56 = vmax.f32 %v252_v39, %v253_v47  ;;  %v47_v57 = vrot.slane %v46_v48, 2  ;;  %v111_v58 = vrot.slane %v110_v49, 2  ;;  %v236_v62 = vsel %vm36_vm0, %v222_v50, -inf }
  0x31   :  { %v128_v60 = vmax.f32 %v126_v43, %v127_v54  ;;  %v191_v61 = vrot.slane %v190_v55, 1  ;;  %v86_v63 = vsel %vm36_vm0, %v35_v51, -inf  ;;  %v174_v3 = vmax.f32 %v172_v45, %v173_v59 }
  0x32   :  { %v255_v0 = vrot.slane %v254_v56, 1  ;;  %v48_v1 = vmax.f32 %v46_v48, %v47_v57  ;;  %v112_v2 = vmax.f32 %v110_v49, %v111_v58  ;;  %v237_v8 = vrot.slane %v236_v62, 4  ;;  %v163_v48 = vld [vmem:[#allocation2 + $0x68] sm:$0xf] }
  0x33   :  { %v192_v5 = vmax.f32 %v190_v55, %v191_v61  ;;  %v289_v7 = vsel %vm285_vm1, %v64_v53, %v128_v60  ;;  %v87_v9 = vrot.slane %v86_v63, 4  ;;  %v175_v14 = vrot.slane %v174_v3, 2  ;;  %v227_v61 = vld [vmem:[#allocation2 + $0x6c] sm:$0xf] }
  0x34   :  { %v256_v11 = vmax.f32 %v254_v56, %v255_v0  ;;  %v49_v12 = vrot.slane %v48_v1, 1  ;;  %v113_v13 = vrot.slane %v112_v2, 1  ;;  %v238_v16 = vmax.f32 %v236_v62, %v237_v8 }
  0x35   :  { %v298_v15 = vsel %vm294_vm2, %v289_v7, %v192_v5  ;;  %v88_v17 = vmax.f32 %v86_v63, %v87_v9  ;;  %v150_v18 = vsel %vm36_vm0, %v100_v4, -inf  ;;  %v176_v24 = vmax.f32 %v174_v3, %v175_v14 }
  0x36   :  { %v895_v21 = vsel %vm303_vm3, %v298_v15, %v256_v11  ;;  %v50_v22 = vmax.f32 %v48_v1, %v49_v12  ;;  %v114_v23 = vmax.f32 %v112_v2, %v113_v13  ;;  %v239_v26 = vrot.slane %v238_v16, 2 }
  0x37   :  { %v322_v25 = vsel %vm312_vm4, %v895_v21, -inf  ;;  %v89_v27 = vrot.slane %v88_v17, 2  ;;  %v151_v29 = vrot.slane %v150_v18, 4  ;;  %v177_v31 = vrot.slane %v176_v24, 1 }
  0x38   :  { %323 = vmax.xlane.f32.xlu1 %v322_v25  ;;  %v287_v32 = vsel %vm285_vm1, %v50_v22, %v114_v23  ;;  %v214_v33 = vsel %vm36_vm0, %v164_v19, -inf  ;;  %v278_v34 = vsel %vm36_vm0, %v228_v20, -inf  ;;  %v240_v35 = vmax.f32 %v238_v16, %v239_v26 }
  0x39   :  { %v90_v36 = vmax.f32 %v88_v17, %v89_v27  ;;  %v152_v37 = vmax.f32 %v150_v18, %v151_v29  ;;  %v215_v38 = vrot.slane %v214_v33, 4  ;;  %v178_v39 = vmax.f32 %v176_v24, %v177_v31 }
  0x3a   :  { %v279_v40 = vrot.slane %v278_v34, 4  ;;  %vm337_vm5 = vcmask 60448   ;;  %v79_v41 = vsel %vm36_vm0, %v34_v30, -inf  ;;  %v241_v43 = vrot.slane %v240_v35, 1 }
  0x3b   :  { %v91_v44 = vrot.slane %v90_v36, 1  ;;  %v153_v45 = vrot.slane %v152_v37, 2  ;;  %v216_v47 = vmax.f32 %v214_v33, %v215_v38  ;;  %v296_v49 = vsel %vm294_vm2, %v287_v32, %v178_v39 }
  0x3c   :  { %v280_v50 = vmax.f32 %v278_v34, %v279_v40  ;;  %v338_v51 = vsel %vm337_vm5, %v873_v10, -inf  ;;  %v80_v52 = vrot.slane %v79_v41, 4  ;;  %v242_v53 = vmax.f32 %v240_v35, %v241_v43 }
  0x3d   :  { %v92_v54 = vmax.f32 %v90_v36, %v91_v44  ;;  %v154_v55 = vmax.f32 %v152_v37, %v153_v45  ;;  %v217_v56 = vrot.slane %v216_v47, 2  ;;  %339 = vmax.xlane.f32.xlu2 %v338_v51  ;;  %v143_v59 = vsel %vm36_vm0, %v99_v42, -inf }
  0x3e   :  { %v281_v57 = vrot.slane %v280_v50, 2  ;;  %v81_v58 = vmax.f32 %v79_v41, %v80_v52  ;;  %v207_v60 = vsel %vm36_vm0, %v163_v48, -inf  ;;  %v909_v62 = vsel %vm303_vm3, %v296_v49, %v242_v53 }
  0x3f   :  { %v155_v63 = vrot.slane %v154_v55, 1  ;;  %v218_v0 = vmax.f32 %v216_v47, %v217_v56  ;;  %v144_v1 = vrot.slane %v143_v59, 4  ;;  %v316_v2 = vsel %vm312_vm4, %v909_v62, -inf }
  0x40   :  { %v282_v3 = vmax.f32 %v280_v50, %v281_v57  ;;  %v82_v4 = vrot.slane %v81_v58, 2  ;;  %v208_v5 = vrot.slane %v207_v60, 4  ;;  %317 = vmax.xlane.f32.xlu0 %v316_v2  ;;  %v271_v11 = vsel %vm36_vm0, %v227_v61, -inf }
  0x41   :  { %v156_v7 = vmax.f32 %v154_v55, %v155_v63  ;;  %v219_v8 = vrot.slane %v218_v0, 1  ;;  %v145_v9 = vmax.f32 %v143_v59, %v144_v1  ;;  %v272_v15 = vrot.slane %v271_v11, 4 }
  0x42   :  { %v283_v12 = vrot.slane %v282_v3, 1  ;;  %v83_v13 = vmax.f32 %v81_v58, %v82_v4  ;;  %v209_v14 = vmax.f32 %v207_v60, %v208_v5  ;;  %v347_v26 = vsel %vm337_vm5, %v895_v21, -inf }
  0x43   :  { %v220_v16 = vmax.f32 %v218_v0, %v219_v8  ;;  %v293_v17 = vsel %vm285_vm1, %v92_v54, %v156_v7  ;;  %v146_v18 = vrot.slane %v145_v9, 2  ;;  %v273_v23 = vmax.f32 %v271_v11, %v272_v15 }
  0x44   :  { %v284_v19 = vmax.f32 %v282_v3, %v283_v12  ;;  %v84_v20 = vrot.slane %v83_v13, 1  ;;  %v210_v22 = vrot.slane %v209_v14, 2  ;;  %v344_v42 = vsel %vm337_vm5, %v862_v28, -inf }
  0x45   :  { %v302_v24 = vsel %vm294_vm2, %v293_v17, %v220_v16  ;;  %v147_v25 = vmax.f32 %v145_v9, %v146_v18  ;;  %v274_v30 = vrot.slane %v273_v23, 2  ;;  %348 = vmax.xlane.f32.xlu2 %v347_v26  ;;  %vm362_vm6 = vcmask 93248  }
  0x46   :  { %v311_v27 = vsel %vm303_vm3, %v302_v24, %v284_v19  ;;  %v211_v29 = vmax.f32 %v209_v14, %v210_v22  ;;  %v85_v32 = vmax.f32 %v83_v13, %v84_v20  ;;  %v341_v47 = vsel %vm337_vm5, %v909_v62, -inf }
  0x47   :  { %v334_v31 = vsel %vm312_vm4, %v311_v27, -inf  ;;  %v148_v33 = vrot.slane %v147_v25, 1  ;;  %v275_v35 = vmax.f32 %v273_v23, %v274_v30  ;;  %v353_v48 = vsel %vm337_vm5, %v885_v46, -inf }
  0x48   :  { %335 = vmax.xlane.f32.xlu1 %v334_v31  ;;  %v212_v34 = vrot.slane %v211_v29, 1  ;;  %v366_v49 = vsel %vm362_vm6, %v909_v62, -inf  ;;  %v350_v50 = vsel %vm337_vm5, %v851_v6, -inf  ;;  %v363_v51 = vsel %vm362_vm6, %v873_v10, -inf }
  0x49   :  { %v149_v36 = vmax.f32 %v147_v25, %v148_v33  ;;  %v276_v38 = vrot.slane %v275_v35, 1  ;;  %v375_v52 = vsel %vm362_vm6, %v851_v6, -inf  ;;  %v359_v53 = vsel %vm337_vm5, %v311_v27, -inf }
  0x4a   :  { %v213_v37 = vmax.f32 %v211_v29, %v212_v34  ;;  %v372_v54 = vsel %vm362_vm6, %v895_v21, -inf  ;;  %v384_v55 = vsel %vm362_vm6, %v311_v27, -inf  ;;  %vm387_vm7 = vcmask 126048  }
  0x4b   :  { %v292_v39 = vsel %vm285_vm1, %v85_v32, %v149_v36  ;;  %v277_v40 = vmax.f32 %v275_v35, %v276_v38  ;;  %v369_v56 = vsel %vm362_vm6, %v862_v28, -inf  ;;  %v394_v58 = vsel %vm387_vm7, %v862_v28, -inf }
  0x4c   :  { %v301_v41 = vsel %vm294_vm2, %v292_v39, %v213_v37  ;;  %v378_v59 = vsel %vm362_vm6, %v885_v46, -inf  ;;  %v391_v60 = vsel %vm387_vm7, %v909_v62, -inf  ;;  %v403_v61 = vsel %vm387_vm7, %v885_v46, -inf }
  0x4d   :  { %v310_v43 = vsel %vm303_vm3, %v301_v41, %v277_v40  ;;  %v388_v63 = vsel %vm387_vm7, %v873_v10, -inf  ;;  %v400_v28 = vsel %vm387_vm7, %v851_v6, -inf  ;;  %v397_v0 = vsel %vm387_vm7, %v895_v21, -inf }
  0x4e   :  { %v331_v44 = vsel %vm312_vm4, %v310_v43, -inf  ;;  %v356_v45 = vsel %vm337_vm5, %v310_v43, -inf  ;;  %v381_v57 = vsel %vm362_vm6, %v310_v43, -inf  ;;  %v409_v1 = vsel %vm387_vm7, %v311_v27, -inf }
  0x4f   :  { %332 = vmax.xlane.f32.xlu0 %v331_v44  ;;  %357 = vmax.xlane.f32.xlu2 %v356_v45  ;;  %v406_v46 = vsel %vm387_vm7, %v310_v43, -inf  ;;  %vm412_vm8 = vcmask 7168   ;;  %vm430_vm9 = vcmask 23552   ;;  %vm421_vm10 = vcmask 15360  }
  0x50   :  { %345 = vmax.xlane.f32.xlu1 %v344_v42  ;;  %vm439_vm11 = vcmask 25600   ;;  %vm496_vm12 = vcmask 27650   ;;  %vm561_vm13 = vcmask 9216   ;;  %vm586_vm14 = vcmask 25616  }
  0x51   :  { %vm699_vm15 = vcmask 0  }
  0x57   :  { %342 = vmax.xlane.f32.xlu0 %v341_v47  ;;  %367 = vmax.xlane.f32.xlu2 %v366_v49 }
  0x58   :  { %354 = vmax.xlane.f32.xlu1 %v353_v48 }
  0x5f   :  { %351 = vmax.xlane.f32.xlu0 %v350_v50  ;;  %376 = vmax.xlane.f32.xlu2 %v375_v52 }
  0x60   :  { %364 = vmax.xlane.f32.xlu1 %v363_v51 }
  0x67   :  { %360 = vmax.xlane.f32.xlu0 %v359_v53  ;;  %385 = vmax.xlane.f32.xlu2 %v384_v55 }
  0x68   :  { %373 = vmax.xlane.f32.xlu1 %v372_v54 }
  0x6f   :  { %370 = vmax.xlane.f32.xlu0 %v369_v56  ;;  %395 = vmax.xlane.f32.xlu2 %v394_v58 }
  0x70   :  { %382 = vmax.xlane.f32.xlu1 %v381_v57 }
  0x77   :  { %379 = vmax.xlane.f32.xlu0 %v378_v59  ;;  %404 = vmax.xlane.f32.xlu2 %v403_v61 }
  0x78   :  { %392 = vmax.xlane.f32.xlu1 %v391_v60 }
  0x7f   :  { %389 = vmax.xlane.f32.xlu0 %v388_v63 }
  0x80   :  { %401 = vmax.xlane.f32.xlu1 %v400_v28 }
  0x87   :  { %398 = vmax.xlane.f32.xlu0 %v397_v0 }
  0x88   :  { %410 = vmax.xlane.f32.xlu1 %v409_v1 }
  0x8c   :  { %v327_v62 = vpop.xlane.xlu2 %326 }
  0x8f   :  { %407 = vmax.xlane.f32.xlu0 %v406_v46 }
  0x90   :  { %v321_v3 = vpop.xlane.xlu1 %320 }
  0x9b   :  { %v315_v4 = vpop.xlane.xlu0 %314 }
  0xa2   :  { %v330_v2 = vpop.xlane.xlu2 %329 }
  0xab   :  { %v324_v5 = vpop.xlane.xlu1 %323 }
  0xb0   :  { %v340_v10 = vpop.xlane.xlu2 %339 }
  0xb1   :  { %v413_v35 = vsel %vm412_vm8, %v315_v4, %v340_v10 }
  0xb3   :  { %v318_v7 = vpop.xlane.xlu0 %317 }
  0xb8   :  { %v349_v6 = vpop.xlane.xlu2 %348 }
  0xb9   :  { %v416_v36 = vsel %vm412_vm8, %v324_v5, %v349_v6 }
  0xbb   :  { %v962_v8 = vpop.xlane.xlu1 %335 }
  0xc2   :  { %v333_v9 = vpop.xlane.xlu0 %332  ;;  %v358_v21 = vpop.xlane.xlu2 %357 }
  0xc3   :  { %v346_v11 = vpop.xlane.xlu1 %345  ;;  %v419_v38 = vsel %vm412_vm8, %v333_v9, %v358_v21 }
  0xc4   :  { %v415_v22 = vsel %vm412_vm8, %v321_v3, %v346_v11 }
  0xca   :  { %v343_v12 = vpop.xlane.xlu0 %342  ;;  %v368_v14 = vpop.xlane.xlu2 %367 }
  0xcb   :  { %v355_v13 = vpop.xlane.xlu1 %354  ;;  %v414_v37 = vsel %vm412_vm8, %v318_v7, %v343_v12 }
  0xcc   :  { %v418_v39 = vsel %vm412_vm8, %v330_v2, %v355_v13  ;;  %v423_v40 = vsel %vm421_vm10, %v414_v37, %v368_v14 }
  0xd2   :  { %v352_v15 = vpop.xlane.xlu0 %351  ;;  %v377_v17 = vpop.xlane.xlu2 %376 }
  0xd3   :  { %v365_v16 = vpop.xlane.xlu1 %364  ;;  %v417_v45 = vsel %vm412_vm8, %v327_v62, %v352_v15 }
  0xd4   :  { %v422_v47 = vsel %vm421_vm10, %v413_v35, %v365_v16  ;;  %v426_v55 = vsel %vm421_vm10, %v417_v45, %v377_v17 }
  0xda   :  { %v361_v18 = vpop.xlane.xlu0 %360  ;;  %v386_v20 = vpop.xlane.xlu2 %385 }
  0xdb   :  { %v374_v19 = vpop.xlane.xlu1 %373  ;;  %v420_v62 = vsel %vm412_vm8, %v962_v8, %v361_v18 }
  0xdc   :  { %v425_v2 = vsel %vm421_vm10, %v416_v36, %v374_v19  ;;  %v429_v10 = vsel %vm421_vm10, %v420_v62, %v386_v20 }
  0xe2   :  { %v371_v23 = vpop.xlane.xlu0 %370  ;;  %v396_v26 = vpop.xlane.xlu2 %395 }
  0xe3   :  { %v383_v24 = vpop.xlane.xlu1 %382  ;;  %v424_v25 = vsel %vm421_vm10, %v415_v22, %v371_v23 }
  0xe4   :  { %v433_v27 = vsel %vm430_vm9, %v424_v25, %v396_v26  ;;  %v993_v6 = vsel %vm421_vm10, %v419_v38, %v383_v24 }
  0xe5   :  { %v454_v29 = vsel %vm439_vm11, %v433_v27, -inf  ;;  %v511_v30 = vsel %vm496_vm12, %v433_v27, -inf  ;;  %718 = vst.msk [vmem:[#allocation5 + $0x8] sm:$0xf] %vm312_vm4, %v433_v27 }
  0xe6   :  { %v455_v31 = vrot.slane %v454_v29, 4  ;;  %v512_v32 = vrot.slane %v511_v30, 4 }
  0xe8   :  { %v456_v33 = vmax.f32 %v454_v29, %v455_v31  ;;  %v513_v34 = vmax.f32 %v511_v30, %v512_v32 }
  0xea   :  { %v380_v41 = vpop.xlane.xlu0 %379  ;;  %v457_v43 = vrot.slane %v456_v33, 2  ;;  %v514_v44 = vrot.slane %v513_v34, 2  ;;  %v405_v50 = vpop.xlane.xlu2 %404 }
  0xeb   :  { %v393_v42 = vpop.xlane.xlu1 %392  ;;  %v427_v48 = vsel %vm421_vm10, %v418_v39, %v380_v41 }
  0xec   :  { %v432_v49 = vsel %vm430_vm9, %v423_v40, %v393_v42  ;;  %v458_v53 = vmax.f32 %v456_v33, %v457_v43  ;;  %v515_v54 = vmax.f32 %v513_v34, %v514_v44  ;;  %v436_v58 = vsel %vm430_vm9, %v427_v48, %v405_v50 }
  0xed   :  { %v447_v51 = vsel %vm439_vm11, %v432_v49, -inf  ;;  %v504_v52 = vsel %vm496_vm12, %v432_v49, -inf  ;;  %717 = vst.msk [vmem:[#allocation5 + $0x4] sm:$0xf] %vm312_vm4, %v432_v49  ;;  %v475_v59 = vsel %vm439_vm11, %v436_v58, -inf  ;;  %v532_v60 = vsel %vm496_vm12, %v436_v58, -inf }
  0xee   :  { %v448_v56 = vrot.slane %v447_v51, 4  ;;  %v505_v57 = vrot.slane %v504_v52, 4  ;;  %721 = vst.msk [vmem:[#allocation5 + $0x14] sm:$0xf] %vm312_vm4, %v436_v58  ;;  %v459_v61 = vrot.slane %v458_v53, 1  ;;  %v516_v63 = vrot.slane %v515_v54, 1 }
  0xef   :  { %v476_v1 = vrot.slane %v475_v59, 4  ;;  %v533_v46 = vrot.slane %v532_v60, 4 }
  0xf0   :  { %v449_v28 = vmax.f32 %v447_v51, %v448_v56  ;;  %v506_v0 = vmax.f32 %v504_v52, %v505_v57  ;;  %v460_v3 = vmax.f32 %v458_v53, %v459_v61  ;;  %v517_v4 = vmax.f32 %v515_v54, %v516_v63 }
  0xf1   :  { %v477_v21 = vmax.f32 %v475_v59, %v476_v1  ;;  %v534_v12 = vmax.f32 %v532_v60, %v533_v46 }
  0xf2   :  { %v450_v5 = vrot.slane %v449_v28, 2  ;;  %v507_v7 = vrot.slane %v506_v0, 2  ;;  %v390_v9 = vpop.xlane.xlu0 %389  ;;  %v996_v13 = vsel %vm285_vm1, %v460_v3, %v517_v4 }
  0xf3   :  { %v402_v11 = vpop.xlane.xlu1 %401  ;;  %v431_v15 = vsel %vm430_vm9, %v422_v47, %v390_v9  ;;  %v478_v26 = vrot.slane %v477_v21, 2  ;;  %v535_v27 = vrot.slane %v534_v12, 2  ;;  %v568_v47 = vsel %vm561_vm13, %v996_v13, -inf }
  0xf4   :  { %v451_v8 = vmax.f32 %v449_v28, %v450_v5  ;;  %v508_v14 = vmax.f32 %v506_v0, %v507_v7  ;;  %v435_v16 = vsel %vm430_vm9, %v426_v55, %v402_v11  ;;  %v440_v17 = vsel %vm439_vm11, %v431_v15, -inf  ;;  %716 = vst.msk [vmem:[#allocation5] sm:$0xf] %vm312_vm4, %v431_v15  ;;  %569 = vmax.xlane.f32.xlu1 %v568_v47 }
  0xf5   :  { %v497_v18 = vsel %vm496_vm12, %v431_v15, -inf  ;;  %v468_v19 = vsel %vm439_vm11, %v435_v16, -inf  ;;  %v525_v20 = vsel %vm496_vm12, %v435_v16, -inf  ;;  %v441_v22 = vrot.slane %v440_v17, 4  ;;  %720 = vst.msk [vmem:[#allocation5 + $0x10] sm:$0xf] %vm312_vm4, %v435_v16 }
  0xf6   :  { %v498_v23 = vrot.slane %v497_v18, 4  ;;  %v469_v24 = vrot.slane %v468_v19, 4  ;;  %v526_v25 = vrot.slane %v525_v20, 4  ;;  %v452_v29 = vrot.slane %v451_v8, 1 }
  0xf7   :  { %v509_v30 = vrot.slane %v508_v14, 1  ;;  %v442_v31 = vmax.f32 %v440_v17, %v441_v22  ;;  %v479_v35 = vmax.f32 %v477_v21, %v478_v26  ;;  %v536_v36 = vmax.f32 %v534_v12, %v535_v27 }
  0xf8   :  { %v499_v32 = vmax.f32 %v497_v18, %v498_v23  ;;  %v470_v33 = vmax.f32 %v468_v19, %v469_v24  ;;  %v527_v34 = vmax.f32 %v525_v20, %v526_v25  ;;  %v453_v37 = vmax.f32 %v451_v8, %v452_v29 }
  0xf9   :  { %v510_v38 = vmax.f32 %v508_v14, %v509_v30  ;;  %v443_v39 = vrot.slane %v442_v31, 2  ;;  %v480_v48 = vrot.slane %v479_v35, 1  ;;  %v537_v49 = vrot.slane %v536_v36, 1 }
  0xfa   :  { %v500_v40 = vrot.slane %v499_v32, 2  ;;  %v471_v41 = vrot.slane %v470_v33, 2  ;;  %v528_v42 = vrot.slane %v527_v34, 2  ;;  %v399_v43 = vpop.xlane.xlu0 %398 }
  0xfb   :  { %v411_v44 = vpop.xlane.xlu1 %410  ;;  %v1007_v45 = vsel %vm285_vm1, %v453_v37, %v510_v38  ;;  %v444_v50 = vmax.f32 %v442_v31, %v443_v39  ;;  %v434_v54 = vsel %vm430_vm9, %v425_v2, %v399_v43  ;;  %v481_v57 = vmax.f32 %v479_v35, %v480_v48 }
  0xfc   :  { %v501_v51 = vmax.f32 %v499_v32, %v500_v40  ;;  %v472_v52 = vmax.f32 %v470_v33, %v471_v41  ;;  %v529_v53 = vmax.f32 %v527_v34, %v528_v42  ;;  %v438_v55 = vsel %vm430_vm9, %v429_v10, %v411_v44  ;;  %719 = vst.msk [vmem:[#allocation5 + $0xc] sm:$0xf] %vm312_vm4, %v434_v54 }
  0xfd   :  { %v565_v56 = vsel %vm561_vm13, %v1007_v45, -inf  ;;  %v461_v58 = vsel %vm439_vm11, %v434_v54, -inf  ;;  %v518_v59 = vsel %vm496_vm12, %v434_v54, -inf  ;;  %v489_v60 = vsel %vm439_vm11, %v438_v55, -inf  ;;  %723 = vst.msk [vmem:[#allocation5 + $0x1c] sm:$0xf] %vm312_vm4, %v438_v55 }
  0xfe   :  { %v546_v61 = vsel %vm496_vm12, %v438_v55, -inf  ;;  %566 = vmax.xlane.f32.xlu0 %v565_v56  ;;  %v462_v63 = vrot.slane %v461_v58, 4  ;;  %v519_v28 = vrot.slane %v518_v59, 4  ;;  %v490_v0 = vrot.slane %v489_v60, 4 }
  0xff   :  { %v547_v1 = vrot.slane %v546_v61, 4  ;;  %v445_v46 = vrot.slane %v444_v50, 1  ;;  %v502_v62 = vrot.slane %v501_v51, 1  ;;  %v473_v2 = vrot.slane %v472_v52, 1 }
 0x100   :  { %v530_v3 = vrot.slane %v529_v53, 1  ;;  %v463_v4 = vmax.f32 %v461_v58, %v462_v63  ;;  %v520_v10 = vmax.f32 %v518_v59, %v519_v28  ;;  %v491_v5 = vmax.f32 %v489_v60, %v490_v0 }
 0x101   :  { %v548_v7 = vmax.f32 %v546_v61, %v547_v1  ;;  %v446_v9 = vmax.f32 %v444_v50, %v445_v46  ;;  %v503_v11 = vmax.f32 %v501_v51, %v502_v62  ;;  %v474_v21 = vmax.f32 %v472_v52, %v473_v2 }
 0x102   :  { %v531_v12 = vmax.f32 %v529_v53, %v530_v3  ;;  %v464_v8 = vrot.slane %v463_v4, 2  ;;  %v521_v14 = vrot.slane %v520_v10, 2  ;;  %v492_v15 = vrot.slane %v491_v5, 2  ;;  %v408_v17 = vpop.xlane.xlu0 %407 }
 0x103   :  { %v549_v16 = vrot.slane %v548_v7, 2  ;;  %v437_v18 = vsel %vm430_vm9, %v993_v6, %v408_v17  ;;  %v553_v19 = vsel %vm285_vm1, %v446_v9, %v503_v11  ;;  %v538_v22 = vmax.f32 %v536_v36, %v537_v49 }
 0x104   :  { %v557_v20 = vsel %vm285_vm1, %v474_v21, %v531_v12  ;;  %v465_v23 = vmax.f32 %v463_v4, %v464_v8  ;;  %v522_v24 = vmax.f32 %v520_v10, %v521_v14  ;;  %v493_v25 = vmax.f32 %v491_v5, %v492_v15  ;;  %722 = vst.msk [vmem:[#allocation5 + $0x18] sm:$0xf] %vm312_vm4, %v437_v18 }
 0x105   :  { %v550_v26 = vmax.f32 %v548_v7, %v549_v16  ;;  %v482_v27 = vsel %vm439_vm11, %v437_v18, -inf  ;;  %v539_v29 = vsel %vm496_vm12, %v437_v18, -inf  ;;  %v562_v30 = vsel %vm561_vm13, %v553_v19, -inf  ;;  %740 = dma.vmem_to_hbm [thread:$0]  %s733_s11, 512, %s735_s9, [#allocation4], %s813_s12, %s813_s12, %s814_s13  }
 0x106   :  { %v574_v31 = vsel %vm561_vm13, %v557_v20, -inf  ;;  %v483_v6 = vrot.slane %v482_v27, 4  ;;  %v540_v32 = vrot.slane %v539_v29, 4  ;;  %563 = vmax.xlane.f32.xlu2 %v562_v30  ;;  %v558_v33 = vsel %vm285_vm1, %v481_v57, %v538_v22 }
 0x107   :  { %575 = vmax.xlane.f32.xlu0 %v574_v31  ;;  %v466_v34 = vrot.slane %v465_v23, 1  ;;  %v577_v35 = vsel %vm561_vm13, %v558_v33, -inf  ;;  %v523_v36 = vrot.slane %v522_v24, 1  ;;  %v494_v37 = vrot.slane %v493_v25, 1 }
 0x108   :  { %v551_v38 = vrot.slane %v550_v26, 1  ;;  %v484_v39 = vmax.f32 %v482_v27, %v483_v6  ;;  %v541_v40 = vmax.f32 %v539_v29, %v540_v32  ;;  %578 = vmax.xlane.f32.xlu1 %v577_v35  ;;  %v587_v57 = vsel %vm586_vm14, %v553_v19, -inf }
 0x109   :  { %v467_v41 = vmax.f32 %v465_v23, %v466_v34  ;;  %v524_v42 = vmax.f32 %v522_v24, %v523_v36  ;;  %v495_v43 = vmax.f32 %v493_v25, %v494_v37  ;;  %v593_v63 = vsel %vm586_vm14, %v996_v13, -inf }
 0x10a   :  { %v552_v44 = vmax.f32 %v550_v26, %v551_v38  ;;  %v485_v47 = vrot.slane %v484_v39, 2  ;;  %v542_v48 = vrot.slane %v541_v40, 2  ;;  %v590_v0 = vsel %vm586_vm14, %v1007_v45, -inf }
 0x10b   :  { %v556_v49 = vsel %vm285_vm1, %v467_v41, %v524_v42  ;;  %v602_v1 = vsel %vm586_vm14, %v558_v33, -inf  ;;  %v599_v62 = vsel %vm586_vm14, %v557_v20, -inf }
 0x10c   :  { %v560_v50 = vsel %vm285_vm1, %v495_v43, %v552_v44  ;;  %v486_v51 = vmax.f32 %v484_v39, %v485_v47  ;;  %v543_v52 = vmax.f32 %v541_v40, %v542_v48  ;;  %v571_v53 = vsel %vm561_vm13, %v556_v49, -inf }
 0x10d   :  { %v583_v54 = vsel %vm561_vm13, %v560_v50, -inf  ;;  %v596_v28 = vsel %vm586_vm14, %v556_v49, -inf  ;;  %v608_v13 = vsel %vm586_vm14, %v560_v50, -inf }
 0x10e   :  { %572 = vmax.xlane.f32.xlu2 %v571_v53  ;;  %v487_v55 = vrot.slane %v486_v51, 1  ;;  %v544_v56 = vrot.slane %v543_v52, 1 }
 0x10f   :  { %584 = vmax.xlane.f32.xlu0 %v583_v54 }
 0x110   :  { %588 = vmax.xlane.f32.xlu1 %v587_v57  ;;  %v488_v58 = vmax.f32 %v486_v51, %v487_v55  ;;  %v545_v59 = vmax.f32 %v543_v52, %v544_v56 }
 0x112   :  { %v559_v60 = vsel %vm285_vm1, %v488_v58, %v545_v59 }
 0x113   :  { %v580_v61 = vsel %vm561_vm13, %v559_v60, -inf  ;;  %v605_v46 = vsel %vm586_vm14, %v559_v60, -inf }
 0x116   :  { %581 = vmax.xlane.f32.xlu2 %v580_v61 }
 0x117   :  { %594 = vmax.xlane.f32.xlu0 %v593_v63 }
 0x118   :  { %597 = vmax.xlane.f32.xlu1 %v596_v28 }
 0x11e   :  { %591 = vmax.xlane.f32.xlu2 %v590_v0 }
 0x11f   :  { %603 = vmax.xlane.f32.xlu0 %v602_v1 }
 0x120   :  { %606 = vmax.xlane.f32.xlu1 %v605_v46 }
 0x126   :  { %600 = vmax.xlane.f32.xlu2 %v599_v62 }
 0x12e   :  { %609 = vmax.xlane.f32.xlu2 %v608_v13 }
 0x167   :  { %v570_v3 = vpop.xlane.xlu1 %569 }
 0x171   :  { %v567_v2 = vpop.xlane.xlu0 %566 }
 0x179   :  { %v564_v4 = vpop.xlane.xlu2 %563 }
 0x17a   :  { %v576_v10 = vpop.xlane.xlu0 %575 }
 0x17b   :  { %v579_v5 = vpop.xlane.xlu1 %578 }
 0x181   :  { %v573_v7 = vpop.xlane.xlu2 %572 }
 0x182   :  { %v1048_v45 = vpop.xlane.xlu0 %584 }
 0x183   :  { %v589_v9 = vpop.xlane.xlu1 %588 }
 0x184   :  { %v611_v11 = vsel %vm412_vm8, %v564_v4, %v589_v9 }
 0x185   :  { %v619_v21 = vsel %vm561_vm13, %v611_v11, -inf  ;;  %708 = vst.msk [vmem:[%s1144_s2] sm:$0x3] %vm561_vm13, %v611_v11 }
 0x186   :  { %v620_v12 = vrot.slane %v619_v21, 4 }
 0x188   :  { %v621_v8 = vmax.f32 %v619_v21, %v620_v12 }
 0x189   :  { %v582_v14 = vpop.xlane.xlu2 %581 }
 0x18a   :  { %v595_v15 = vpop.xlane.xlu0 %594  ;;  %v622_v16 = vrot.slane %v621_v8, 2 }
 0x18b   :  { %v613_v17 = vsel %vm412_vm8, %v570_v3, %v595_v15  ;;  %v598_v18 = vpop.xlane.xlu1 %597 }
 0x18c   :  { %v633_v19 = vsel %vm561_vm13, %v613_v17, -inf  ;;  %710 = vst.msk [vmem:[%s1144_s2 + $0x4] sm:$0x3] %vm561_vm13, %v613_v17  ;;  %v614_v20 = vsel %vm412_vm8, %v573_v7, %v598_v18  ;;  %v623_v23 = vmax.f32 %v621_v8, %v622_v16 }
 0x18d   :  { %v634_v22 = vrot.slane %v633_v19, 4  ;;  %v640_v24 = vsel %vm561_vm13, %v614_v20, -inf  ;;  %711 = vst.msk [vmem:[%s1144_s2 + $0x6] sm:$0x3] %vm561_vm13, %v614_v20 }
 0x18e   :  { %v641_v25 = vrot.slane %v640_v24, 4  ;;  %v624_v27 = vrot.slane %v623_v23, 1 }
 0x18f   :  { %v635_v26 = vmax.f32 %v633_v19, %v634_v22 }
 0x190   :  { %v642_v29 = vmax.f32 %v640_v24, %v641_v25  ;;  %v625_v31 = vmax.f32 %v623_v23, %v624_v27 }
 0x191   :  { %v636_v30 = vrot.slane %v635_v26, 2  ;;  %v592_v6 = vpop.xlane.xlu2 %591 }
 0x192   :  { %v604_v32 = vpop.xlane.xlu0 %603  ;;  %v643_v33 = vrot.slane %v642_v29, 2  ;;  %v612_v34 = vsel %vm412_vm8, %v567_v2, %v592_v6  ;;  %v675_v35 = vsel %vm421_vm10, %v625_v31, -inf }
 0x193   :  { %v616_v36 = vsel %vm412_vm8, %v579_v5, %v604_v32  ;;  %v626_v37 = vsel %vm561_vm13, %v612_v34, -inf  ;;  %709 = vst.msk [vmem:[%s1144_s2 + $0x2] sm:$0x3] %vm561_vm13, %v612_v34  ;;  %676 = vmax.xlane.f32.xlu0 %v675_v35  ;;  %v607_v38 = vpop.xlane.xlu1 %606  ;;  %v637_v40 = vmax.f32 %v635_v26, %v636_v30 }
 0x194   :  { %v654_v39 = vsel %vm561_vm13, %v616_v36, -inf  ;;  %v627_v41 = vrot.slane %v626_v37, 4  ;;  %v617_v42 = vsel %vm412_vm8, %v582_v14, %v607_v38  ;;  %713 = vst.msk [vmem:[%s1144_s2 + $0xa] sm:$0x3] %vm561_vm13, %v616_v36  ;;  %v644_v44 = vmax.f32 %v642_v29, %v643_v33 }
 0x195   :  { %v655_v43 = vrot.slane %v654_v39, 4  ;;  %v661_v47 = vsel %vm561_vm13, %v617_v42, -inf  ;;  %714 = vst.msk [vmem:[%s1144_s2 + $0xc] sm:$0x3] %vm561_vm13, %v617_v42  ;;  %v638_v48 = vrot.slane %v637_v40, 1 }
 0x196   :  { %v628_v49 = vmax.f32 %v626_v37, %v627_v41  ;;  %v662_v50 = vrot.slane %v661_v47, 4  ;;  %v645_v52 = vrot.slane %v644_v44, 1 }
 0x197   :  { %v656_v51 = vmax.f32 %v654_v39, %v655_v43  ;;  %v639_v53 = vmax.f32 %v637_v40, %v638_v48 }
 0x198   :  { %v629_v54 = vrot.slane %v628_v49, 2  ;;  %v663_v55 = vmax.f32 %v661_v47, %v662_v50  ;;  %v646_v57 = vmax.f32 %v644_v44, %v645_v52 }
 0x199   :  { %v657_v56 = vrot.slane %v656_v51, 2  ;;  %v601_v58 = vpop.xlane.xlu2 %600  ;;  %v681_v59 = vsel %vm421_vm10, %v639_v53, -inf }
 0x19a   :  { %v664_v60 = vrot.slane %v663_v55, 2  ;;  %v615_v61 = vsel %vm412_vm8, %v576_v10, %v601_v58  ;;  %v684_v63 = vsel %vm421_vm10, %v646_v57, -inf  ;;  %v630_v28 = vmax.f32 %v628_v49, %v629_v54  ;;  %682 = vmax.xlane.f32.xlu2 %v681_v59 }
 0x19b   :  { %v647_v0 = vsel %vm561_vm13, %v615_v61, -inf  ;;  %712 = vst.msk [vmem:[%s1144_s2 + $0x8] sm:$0x3] %vm561_vm13, %v615_v61  ;;  %685 = vmax.xlane.f32.xlu0 %v684_v63  ;;  %v658_v1 = vmax.f32 %v656_v51, %v657_v56 }
 0x19c   :  { %v648_v46 = vrot.slane %v647_v0, 4  ;;  %v631_v62 = vrot.slane %v630_v28, 1  ;;  %v665_v13 = vmax.f32 %v663_v55, %v664_v60 }
 0x19d   :  { %v659_v2 = vrot.slane %v658_v1, 1 }
 0x19e   :  { %v649_v3 = vmax.f32 %v647_v0, %v648_v46  ;;  %v632_v4 = vmax.f32 %v630_v28, %v631_v62  ;;  %v666_v10 = vrot.slane %v665_v13, 1 }
 0x19f   :  { %v660_v5 = vmax.f32 %v658_v1, %v659_v2 }
 0x1a0   :  { %v650_v7 = vrot.slane %v649_v3, 2  ;;  %v678_v9 = vsel %vm421_vm10, %v632_v4, -inf  ;;  %v667_v11 = vmax.f32 %v665_v13, %v666_v10 }
 0x1a1   :  { %v610_v21 = vpop.xlane.xlu2 %609  ;;  %679 = vmax.xlane.f32.xlu1 %v678_v9  ;;  %v690_v12 = vsel %vm421_vm10, %v660_v5, -inf }
 0x1a2   :  { %v618_v8 = vsel %vm412_vm8, %v1048_v45, %v610_v21  ;;  %v693_v14 = vsel %vm421_vm10, %v667_v11, -inf  ;;  %v651_v15 = vmax.f32 %v649_v3, %v650_v7  ;;  %691 = vmax.xlane.f32.xlu2 %v690_v12 }
 0x1a3   :  { %v668_v16 = vsel %vm561_vm13, %v618_v8, -inf  ;;  %715 = vst.msk [vmem:[%s1144_s2 + $0xe] sm:$0x3] %vm561_vm13, %v618_v8  ;;  %694 = vmax.xlane.f32.xlu0 %v693_v14 }
 0x1a4   :  { %v669_v17 = vrot.slane %v668_v16, 4  ;;  %v652_v18 = vrot.slane %v651_v15, 1 }
 0x1a6   :  { %v670_v19 = vmax.f32 %v668_v16, %v669_v17  ;;  %v653_v45 = vmax.f32 %v651_v15, %v652_v18 }
 0x1a8   :  { %v671_v20 = vrot.slane %v670_v19, 2  ;;  %v687_v22 = vsel %vm421_vm10, %v653_v45, -inf }
 0x1a9   :  { %688 = vmax.xlane.f32.xlu1 %v687_v22 }
 0x1aa   :  { %v672_v23 = vmax.f32 %v670_v19, %v671_v20 }
 0x1ac   :  { %v673_v24 = vrot.slane %v672_v23, 1 }
 0x1ae   :  { %v674_v25 = vmax.f32 %v672_v23, %v673_v24 }
 0x1b0   :  { %v696_v26 = vsel %vm421_vm10, %v674_v25, -inf }
 0x1b1   :  { %697 = vmax.xlane.f32.xlu1 %v696_v26 }
 0x206   :  { %v677_v27 = vpop.xlane.xlu0 %676 }
 0x207   :  { %700 = vst.msk [vmem:[%s1143_s1] sm:$0x1] %vm699_vm15, %v677_v27 }
 0x20d   :  { %v683_v29 = vpop.xlane.xlu2 %682 }
 0x20e   :  { %702 = vst.msk [vmem:[%s1143_s1 + $0x2] sm:$0x1] %vm699_vm15, %v683_v29  ;;  %v686_v30 = vpop.xlane.xlu0 %685 }
 0x20f   :  { %703 = vst.msk [vmem:[%s1143_s1 + $0x3] sm:$0x1] %vm699_vm15, %v686_v30 }
 0x214   :  { %v680_v31 = vpop.xlane.xlu1 %679 }
 0x215   :  { %701 = vst.msk [vmem:[%s1143_s1 + $0x1] sm:$0x1] %vm699_vm15, %v680_v31  ;;  %v692_v6 = vpop.xlane.xlu2 %691 }
 0x216   :  { %705 = vst.msk [vmem:[%s1143_s1 + $0x5] sm:$0x1] %vm699_vm15, %v692_v6  ;;  %v695_v32 = vpop.xlane.xlu0 %694 }
 0x217   :  { %706 = vst.msk [vmem:[%s1143_s1 + $0x6] sm:$0x1] %vm699_vm15, %v695_v32 }
 0x21c   :  { %v689_v33 = vpop.xlane.xlu1 %688 }
 0x21d   :  { %704 = vst.msk [vmem:[%s1143_s1 + $0x4] sm:$0x1] %vm699_vm15, %v689_v33 }
 0x224   :  { %v698_v34 = vpop.xlane.xlu1 %697 }
 0x225   :  { %707 = vst.msk [vmem:[%s1143_s1 + $0x7] sm:$0x1] %vm699_vm15, %v698_v34 }
 0x226   :  { %807 = dma.done.wait [#allocation4], 512  }
 0x227   :  { %808 = vsyncadd [#allocation4], 4294966784 }
 0x228   :  { %749 = vsyncpa [#allocation3], 1 }
 0x229   :  { %750 = vsyncpa [#allocation4], 1 }

</bundles_post_ra>
